<compile_context>
chip_gen: v5e
topology: v5e:2x2
jax: 0.10.0
libtpu: 0.0.40
codegen_flags: <defaults>
</compile_context>

<pallas_src>
import jax
import jax.numpy as jnp
from jax.experimental import pallas as pl
from jax.experimental.pallas import tpu as pltpu


def _round_up(n, m):
    return ((n + m - 1) // m) * m


def _mlp_kernel(x_ref, w1_ref, b1_ref, w2_ref, b2_ref, w3_ref, b3_ref, o_ref):
    x = x_ref[...]                                              # (1, TB), batch on lanes
    # Layer 1: Linear(1, 64) + ReLU -- rank-1 outer product on the VPU (no MXU).
    h1 = jnp.maximum(w1_ref[...] * x + b1_ref[...], 0.0)        # (64, TB)
    # Layer 2: Linear(64, 32) + ReLU -- MXU matmul, f32 accumulation.
    h2 = jnp.dot(w2_ref[...], h1, preferred_element_type=jnp.float32) + b2_ref[...]
    h2 = jnp.maximum(h2, 0.0)                                   # (32, TB)
    # Layer 3: Linear(32, 1) + Sigmoid -- also on the (near-idle) MXU; scalar bias from SMEM.
    z = jnp.dot(w3_ref[...], h2, preferred_element_type=jnp.float32) + b3_ref[0]  # (1, TB)
    o_ref[...] = jax.nn.sigmoid(z)


def discriminator_forward(x, params, *, tile_batch=8192):
    """x: (B, 1) f32 -> (B, 1) f32 probabilities."""
    w1, b1, w2, b2, w3, b3 = params
    B = x.shape[0]

    # Batch tile on the lane axis: multiple of 128, capped at `tile_batch`, and
    # capped at ~half the (rounded) batch so the grid keeps >= 2 steps whenever
    # B > 128 -- the "parallel" axis then actually shards across v7x's two TCs.
    TB = min(tile_batch, _round_up(pl.cdiv(B, 2), 128))
    B_pad = _round_up(B, TB)
    G = B_pad // TB

    # Lane-dense view of the input: (1, B_pad).  The reshape is a free
    # row-major metadata change; only pad (an HBM copy) when actually needed.
    x_flat = x.reshape(1, B)
    x_t = x_flat if B_pad == B else jnp.pad(x_flat, ((0, 0), (0, B_pad - B)))
    # Padded tail lanes compute garbage that is sliced off below (harmless).

    resident = lambda shape: pl.BlockSpec(shape, lambda i: (0, 0))  # VMEM-resident params

    out = pl.pallas_call(
        _mlp_kernel,
        out_shape=jax.ShapeDtypeStruct((1, B_pad), jnp.float32),
        grid=(G,),
        in_specs=[
            pl.BlockSpec((1, TB), lambda i: (0, i)),            # x tile (pipelined)
            resident(w1.shape), resident(b1.shape),             # (64, 1), (64, 1)
            resident(w2.shape), resident(b2.shape),             # (32, 64), (32, 1)
            resident(w3.shape),                                 # (1, 32)
            pl.BlockSpec(memory_space=pltpu.MemorySpace.SMEM),  # b3 scalar in SMEM
        ],
        out_specs=pl.BlockSpec((1, TB), lambda i: (0, i)),      # lane-dense stores
        compiler_params=pltpu.CompilerParams(
            dimension_semantics=("parallel",),                  # megacore on v7x
            vmem_limit_bytes=32 * 1024 * 1024,
        ),
    )(x_t, w1, b1, w2, b2, w3, b3)

    return out[0, :B].reshape(B, 1)


def init_params(key):
    """Deterministic init matching nn.Linear default (uniform +-1/sqrt(fan_in)).

    Weights stored (out, in) like PyTorch; b1/b2 as (out, 1) columns so they
    broadcast over the lane (batch) axis; w3 stays (1, 32) for the MXU matmul;
    b3 is a single scalar of shape (1,) (lives in SMEM inside the kernel).
    """
    def linear(key, fan_in, fan_out):
        kw, kb = jax.random.split(key)
        bound = 1.0 / jnp.sqrt(jnp.float32(fan_in))
        w = jax.random.uniform(kw, (fan_out, fan_in), jnp.float32, -bound, bound)
        b = jax.random.uniform(kb, (fan_out, 1), jnp.float32, -bound, bound)
        return w, b

    k1, k2, k3 = jax.random.split(key, 3)
    w1, b1 = linear(k1, 1, 64)      # (64, 1), (64, 1)
    w2, b2 = linear(k2, 64, 32)     # (32, 64), (32, 1)
    w3, b3 = linear(k3, 32, 1)      # (1, 32), (1, 1)
    b3 = b3.reshape(1)              # scalar for SMEM
    return (w1, b1, w2, b2, w3, b3)


def _reference_forward(x, params):
    w1, b1, w2, b2, w3, b3 = params
    h1 = jnp.maximum(x @ w1.T + b1.T, 0.0)
    h2 = jnp.maximum(h1 @ w2.T + b2.T, 0.0)
    return jax.nn.sigmoid(h2 @ w3.T + b3)


if __name__ == "__main__":
    key = jax.random.PRNGKey(0)
    k_params, k_x = jax.random.split(key)

    params = init_params(k_params)
    x = jax.random.normal(k_x, (8, 1), jnp.float32)   # batch=8, feature dim 1

    out = discriminator_forward(x, params)
    out = jax.block_until_ready(out)

    ref = _reference_forward(x, params)
    assert out.shape == (8, 1)
    assert jnp.allclose(out, ref, atol=1e-5, rtol=1e-5), float(jnp.max(jnp.abs(out - ref)))

    print("KERNEL_OK")
</pallas_src>

<mosaic_0001>
module attributes {stable_mosaic.version = 11 : i64} {
  func.func @_mlp_kernel(%arg0: i32, %arg1: memref<1x128xf32, #tpu.memory_space<vmem>>, %arg2: memref<64x1xf32, #tpu.memory_space<vmem>>, %arg3: memref<64x1xf32, #tpu.memory_space<vmem>>, %arg4: memref<32x64xf32, #tpu.memory_space<vmem>>, %arg5: memref<32x1xf32, #tpu.memory_space<vmem>>, %arg6: memref<1x32xf32, #tpu.memory_space<vmem>>, %arg7: memref<1xf32, #tpu.memory_space<smem>>, %arg8: memref<1x128xf32, #tpu.memory_space<vmem>>) attributes {dimension_semantics = [#tpu.dimension_semantics<parallel>], iteration_bounds = array<i64: 1>, scalar_prefetch = 0 : i64, scratch_operands = 0 : i64, tpu.core_type = #tpu.core_type<tc>, window_params = [{transform_indices = @transform_0, window_bounds = array<i64: 1, 128>}, {pipeline_mode = #tpu.pipeline_mode<synchronous>, transform_indices = @transform_1, window_bounds = array<i64: 64, 1>}, {pipeline_mode = #tpu.pipeline_mode<synchronous>, transform_indices = @transform_2, window_bounds = array<i64: 64, 1>}, {pipeline_mode = #tpu.pipeline_mode<synchronous>, transform_indices = @transform_3, window_bounds = array<i64: 32, 64>}, {pipeline_mode = #tpu.pipeline_mode<synchronous>, transform_indices = @transform_4, window_bounds = array<i64: 32, 1>}, {pipeline_mode = #tpu.pipeline_mode<synchronous>, transform_indices = @transform_5, window_bounds = array<i64: 1, 32>}, {transform_indices = @transform_6, window_bounds = array<i64: 1>}, {transform_indices = @transform_7, window_bounds = array<i64: 1, 128>}]} {
    %c0 = arith.constant 0 : index
    %c0_0 = arith.constant 0 : index
    %0 = vector.load %arg1[%c0, %c0_0] : memref<1x128xf32, #tpu.memory_space<vmem>>, vector<1x128xf32>
    %c0_1 = arith.constant 0 : index
    %c0_2 = arith.constant 0 : index
    %1 = vector.load %arg2[%c0_1, %c0_2] : memref<64x1xf32, #tpu.memory_space<vmem>>, vector<64x1xf32>
    %2 = vector.broadcast %1 : vector<64x1xf32> to vector<64x128xf32>
    %3 = vector.broadcast %0 : vector<1x128xf32> to vector<64x128xf32>
    %4 = arith.mulf %2, %3 : vector<64x128xf32>
    %c0_3 = arith.constant 0 : index
    %c0_4 = arith.constant 0 : index
    %5 = vector.load %arg3[%c0_3, %c0_4] : memref<64x1xf32, #tpu.memory_space<vmem>>, vector<64x1xf32>
    %6 = vector.broadcast %5 : vector<64x1xf32> to vector<64x128xf32>
    %7 = arith.addf %4, %6 : vector<64x128xf32>
    %cst = arith.constant 0.000000e+00 : f32
    %8 = vector.broadcast %cst : f32 to vector<64x128xf32>
    %9 = arith.maximumf %7, %8 : vector<64x128xf32>
    %c0_5 = arith.constant 0 : index
    %c0_6 = arith.constant 0 : index
    %10 = vector.load %arg4[%c0_5, %c0_6] : memref<32x64xf32, #tpu.memory_space<vmem>>, vector<32x64xf32>
    %cst_7 = arith.constant dense<0.000000e+00> : vector<32x128xf32>
    %11 = tpu.matmul %10, %9, %cst_7 {dimension_numbers = #tpu.dot_dimension_numbers<[1], [0], [0], [1], [0, 0, 1, 1], [], []>} : vector<32x64xf32>, vector<64x128xf32>, vector<32x128xf32> -> vector<32x128xf32>
    %c0_8 = arith.constant 0 : index
    %c0_9 = arith.constant 0 : index
    %12 = vector.load %arg5[%c0_8, %c0_9] : memref<32x1xf32, #tpu.memory_space<vmem>>, vector<32x1xf32>
    %13 = vector.broadcast %12 : vector<32x1xf32> to vector<32x128xf32>
    %14 = arith.addf %11, %13 : vector<32x128xf32>
    %cst_10 = arith.constant 0.000000e+00 : f32
    %15 = vector.broadcast %cst_10 : f32 to vector<32x128xf32>
    %16 = arith.maximumf %14, %15 : vector<32x128xf32>
    %c0_11 = arith.constant 0 : index
    %c0_12 = arith.constant 0 : index
    %17 = vector.load %arg6[%c0_11, %c0_12] : memref<1x32xf32, #tpu.memory_space<vmem>>, vector<1x32xf32>
    %cst_13 = arith.constant dense<0.000000e+00> : vector<1x128xf32>
    %18 = tpu.matmul %17, %16, %cst_13 {dimension_numbers = #tpu.dot_dimension_numbers<[1], [0], [0], [1], [0, 0, 1, 1], [], []>} : vector<1x32xf32>, vector<32x128xf32>, vector<1x128xf32> -> vector<1x128xf32>
    %c0_14 = arith.constant 0 : index
    %19 = memref.load %arg7[%c0_14] : memref<1xf32, #tpu.memory_space<smem>>
    %20 = vector.broadcast %19 : f32 to vector<1x128xf32>
    %21 = arith.addf %18, %20 : vector<1x128xf32>
    %22 = arith.negf %21 : vector<1x128xf32>
    %23 = math.exp %22 : vector<1x128xf32>
    %cst_15 = arith.constant 1.000000e+00 : f32
    %24 = vector.broadcast %cst_15 : f32 to vector<1x128xf32>
    %25 = arith.addf %24, %23 : vector<1x128xf32>
    %26 = arith.divf %24, %25 : vector<1x128xf32>
    %c0_16 = arith.constant 0 : index
    %c0_17 = arith.constant 0 : index
    %27 = vector.load %arg8[%c0_16, %c0_17] : memref<1x128xf32, #tpu.memory_space<vmem>>, vector<1x128xf32>
    tpu.vector_store %arg8[%c0_16, %c0_17], %26 {strides = array<i32>} : memref<1x128xf32, #tpu.memory_space<vmem>>, vector<1x128xf32>,
    return
  }
  func.func @transform_0(%arg0: i32) -> (i32, i32) {
    %c0_i32 = arith.constant 0 : i32
    %c0_i32_0 = arith.constant 0 : i32
    return %c0_i32, %arg0 : i32, i32
  }
  func.func @transform_1(%arg0: i32) -> (i32, i32) {
    %c0_i32 = arith.constant 0 : i32
    %c0_i32_0 = arith.constant 0 : i32
    %c0_i32_1 = arith.constant 0 : i32
    return %c0_i32, %c0_i32_0 : i32, i32
  }
  func.func @transform_2(%arg0: i32) -> (i32, i32) {
    %c0_i32 = arith.constant 0 : i32
    %c0_i32_0 = arith.constant 0 : i32
    %c0_i32_1 = arith.constant 0 : i32
    return %c0_i32, %c0_i32_0 : i32, i32
  }
  func.func @transform_3(%arg0: i32) -> (i32, i32) {
    %c0_i32 = arith.constant 0 : i32
    %c0_i32_0 = arith.constant 0 : i32
    %c0_i32_1 = arith.constant 0 : i32
    return %c0_i32, %c0_i32_0 : i32, i32
  }
  func.func @transform_4(%arg0: i32) -> (i32, i32) {
    %c0_i32 = arith.constant 0 : i32
    %c0_i32_0 = arith.constant 0 : i32
    %c0_i32_1 = arith.constant 0 : i32
    return %c0_i32, %c0_i32_0 : i32, i32
  }
  func.func @transform_5(%arg0: i32) -> (i32, i32) {
    %c0_i32 = arith.constant 0 : i32
    %c0_i32_0 = arith.constant 0 : i32
    %c0_i32_1 = arith.constant 0 : i32
    return %c0_i32, %c0_i32_0 : i32, i32
  }
  func.func @transform_6(%arg0: i32) -> i32 {
    %c0_i32 = arith.constant 0 : i32
    %c0_i32_0 = arith.constant 0 : i32
    return %c0_i32 : i32
  }
  func.func @transform_7(%arg0: i32) -> (i32, i32) {
    %c0_i32 = arith.constant 0 : i32
    %c0_i32_0 = arith.constant 0 : i32
    return %c0_i32, %arg0 : i32, i32
  }
}

</mosaic_0001>

<bundles_post_ra>
// kernel: tpu_custom_call.1
= control target key start
LH: loop header
LB: loop body
LE: loop exit
PB: predicated region body
PF: predicated region fallthrough
CT: control target
= control target key end

     0   :  { %v347_v3 = vmov 0   ;;  %s473_s0 = inlined_call_operand.vmem [shape: f32[1,128], index: 0, kind: input, shape index: {}]   ;;  %s474_s1 = inlined_call_operand.vmem [shape: f32[64,1], index: 1, kind: input, shape index: {}]   ;;  %s475_s2 = inlined_call_operand.vmem [shape: f32[64,1], index: 2, kind: input, shape index: {}]   ;;  %s476_s3 = inlined_call_operand.vmem [shape: f32[32,64], index: 3, kind: input, shape index: {}]   ;;  %s477_s4 = inlined_call_operand.vmem [shape: f32[32,1], index: 4, kind: input, shape index: {}]   ;;  %s478_s5 = inlined_call_operand.vmem [shape: f32[1,32], index: 5, kind: input, shape index: {}]   ;;  %s479_s6 = inlined_call_operand.<no memory space> [shape: f32[1], index: 6, kind: input, shape index: {}]   ;;  %s480_s7 = inlined_call_operand.hbm [shape: f32[1,128], index: 7, kind: output, shape index: {}]  }
   0x1   :  { %v94_v0 = vld [vmem:[%s475_s2 + $0x30] sm:$0xff]  ;;  %v95_v1 = vld [vmem:[%s475_s2 + $0x38] sm:$0xff]  ;;  %315 = vset.pattern.permute.xlu2 %v347_v3  ;;  %314 = vset.pattern.permute.xlu1 %v347_v3 }
   0x2   :  { %v36_v2 = vld [vmem:[%s474_s1 + $0x38] sm:$0xff]  ;;  %313 = vset.pattern.permute.xlu0 %v347_v3  ;;  %128 = vperm.xlu2 %315, %v94_v0  }
   0x3   :  { %133 = vperm.xlu1 %314, %v95_v1   ;;  %74 = vperm.xlu0 %313, %v36_v2  }
   0x4   :  { %13 = vsyncpa [#allocation4], 0  ;;  %v33_v4 = vld [vmem:[%s474_s1 + $0x20] sm:$0xff]  ;;  %v35_v5 = vld [vmem:[%s474_s1 + $0x30] sm:$0xff]  ;;  %vm180_vm0 = vcmask 523264   ;;  %vm229_vm1 = vcmask 261120  }
   0x5   :  { %v34_v6 = vld [vmem:[%s474_s1 + $0x28] sm:$0xff]  ;;  %v92_v7 = vld [vmem:[%s475_s2 + $0x20] sm:$0xff]  ;;  %v32_v9 = vld [vmem:[%s474_s1 + $0x18] sm:$0xff] }
   0x6   :  { %v93_v8 = vld [vmem:[%s475_s2 + $0x28] sm:$0xff]  ;;  %v91_v11 = vld [vmem:[%s475_s2 + $0x18] sm:$0xff]  ;;  %v31_v12 = vld [vmem:[%s474_s1 + $0x10] sm:$0xff] }
   0x7   :  { %v30_v10 = vld [vmem:[%s474_s1 + $0x8] sm:$0xff]  ;;  %v90_v14 = vld [vmem:[%s475_s2 + $0x10] sm:$0xff]  ;;  %v29_v15 = vld [vmem:[%s474_s1] sm:$0xff] }
   0x8   :  { %v89_v13 = vld [vmem:[%s475_s2 + $0x8] sm:$0xff]  ;;  %v158_v16 = vld [vmem:[%s477_s4 + $0x10] sm:$0xff]  ;;  %v88_v17 = vld [vmem:[%s475_s2] sm:$0xff] }
   0x9   :  { %v159_v18 = vld [vmem:[%s477_s4 + $0x18] sm:$0xff]  ;;  %v157_v19 = vld [vmem:[%s477_s4 + $0x8] sm:$0xff]  ;;  %v156_v20 = vld [vmem:[%s477_s4] sm:$0xff] }
   0xa   :  { %59 = vperm.xlu2 %315, %v33_v4   ;;  %v316_v22 = vld [vmem:[%s473_s0] ss:$0 sm:$0xff]  ;;  %v153_v63 = vld [vmem:[%s476_s3 + $0x8] sm:$0xff]  ;;  %v154_v0 = vld [vmem:[%s476_s3 + $0x10] sm:$0xff] }
   0xb   :  { %69 = vperm.xlu0 %313, %v35_v5   ;;  %64 = vperm.xlu1 %314, %v34_v6   ;;  %v152_v62 = vld [vmem:[%s476_s3] sm:$0xff]  ;;  %v155_v1 = vld [vmem:[%s476_s3 + $0x18] sm:$0xff] }
  0x12   :  { %118 = vperm.xlu2 %315, %v92_v7  }
  0x13   :  { %123 = vperm.xlu0 %313, %v93_v8   ;;  %54 = vperm.xlu1 %314, %v32_v9  }
  0x1a   :  { %44 = vperm.xlu2 %315, %v30_v10  }
  0x1b   :  { %113 = vperm.xlu1 %314, %v91_v11   ;;  %49 = vperm.xlu0 %313, %v31_v12  }
  0x22   :  { %103 = vperm.xlu2 %315, %v89_v13  }
  0x23   :  { %108 = vperm.xlu0 %313, %v90_v14   ;;  %39 = vperm.xlu1 %314, %v29_v15  }
  0x2a   :  { %172 = vperm.xlu2 %315, %v158_v16  }
  0x2b   :  { %98 = vperm.xlu0 %313, %v88_v17   ;;  %177 = vperm.xlu1 %314, %v159_v18   ;;  %v226_v18 = vld [vmem:[%s478_s5] sm:$0x1]  ;;  %s348_s5 = smov [#allocation3]  }
  0x2c   :  { %s278_s27 = sshll.u32 %s348_s5, 4  ;;  %s279_s27 = int_to_ptr.vmem [resolvable:$true] %s278_s27 }
  0x33   :  { %167 = vperm.xlu0 %313, %v157_v19   ;;  %162 = vperm.xlu1 %314, %v156_v20   ;;  %v228_v19 = vstv %s479_s6  ;;  %s280_s6 = sshll.u32 %s480_s7, 4  ;;  %s281_s6 = int_to_ptr.hbm [resolvable:$true] %s280_s6 }
  0x5c   :  { %v129_v21 = vpop.permute.xlu2 %128 }
  0x64   :  { %v60_v23 = vpop.permute.xlu2 %59 }
  0x65   :  { %v84_v34 = vmul.f32 %v316_v22, %v60_v23 }
  0x6c   :  { %v119_v32 = vpop.permute.xlu2 %118 }
  0x6d   :  { %v140_v39 = vadd.f32 %v119_v32, %v84_v34 }
  0x6f   :  { %v148_v43 = vmax.f32 %v140_v39, 0.0 }
  0x74   :  { %v45_v42 = vpop.permute.xlu2 %44 }
  0x75   :  { %v134_v24 = vpop.permute.xlu1 %133  ;;  %v75_v25 = vpop.permute.xlu0 %74  ;;  %v81_v49 = vmul.f32 %v316_v22, %v45_v42 }
  0x76   :  { %v87_v26 = vmul.f32 %v316_v22, %v75_v25 }
  0x78   :  { %v143_v27 = vadd.f32 %v134_v24, %v87_v26 }
  0x7a   :  { %v151_v28 = vmax.f32 %v143_v27, 0.0 }
  0x7c   :  { %201 = vmatpush.msra.mxu0 %v151_v28  ;;  %295 = vmatpush.msra.mxu2 %v151_v28  ;;  %v104_v50 = vpop.permute.xlu2 %103 }
  0x7d   :  { %296 = vmatpush.msra.mxu3 %v151_v28  ;;  %v70_v29 = vpop.permute.xlu0 %69  ;;  %v65_v30 = vpop.permute.xlu1 %64  ;;  %v137_v53 = vadd.f32 %v104_v50, %v81_v49 }
  0x7e   :  { %v86_v31 = vmul.f32 %v316_v22, %v70_v29  ;;  %v85_v36 = vmul.f32 %v316_v22, %v65_v30 }
  0x7f   :  { %v145_v57 = vmax.f32 %v137_v53, 0.0 }
  0x80   :  { %v142_v33 = vadd.f32 %v129_v21, %v86_v31 }
  0x82   :  { %v150_v35 = vmax.f32 %v142_v33, 0.0 }
  0x84   :  { %202 = vmatpush.msra.mxu0 %v150_v35  ;;  %297 = vmatpush.msra.mxu2 %v150_v35  ;;  %v173_v4 = vpop.permute.xlu2 %172 }
  0x85   :  { %298 = vmatpush.msra.mxu3 %v150_v35  ;;  %v124_v37 = vpop.permute.xlu0 %123  ;;  %v55_v38 = vpop.permute.xlu1 %54 }
  0x86   :  { %v141_v40 = vadd.f32 %v124_v37, %v85_v36  ;;  %v83_v44 = vmul.f32 %v316_v22, %v55_v38 }
  0x88   :  { %v149_v41 = vmax.f32 %v141_v40, 0.0 }
  0x8a   :  { %203 = vmatpush.msra.mxu0 %v149_v41  ;;  %299 = vmatpush.msra.mxu2 %v149_v41 }
  0x8b   :  { %300 = vmatpush.msra.mxu3 %v149_v41 }
  0x8c   :  { %204 = vmatpush.msra.mxu0 %v148_v43  ;;  %301 = vmatpush.msra.mxu2 %v148_v43 }
  0x8d   :  { %302 = vmatpush.msra.mxu3 %v148_v43  ;;  %v114_v45 = vpop.permute.xlu1 %113  ;;  %v50_v46 = vpop.permute.xlu0 %49 }
  0x8e   :  { %v139_v47 = vadd.f32 %v114_v45, %v83_v44  ;;  %v82_v51 = vmul.f32 %v316_v22, %v50_v46 }
  0x90   :  { %v147_v48 = vmax.f32 %v139_v47, 0.0 }
  0x92   :  { %205 = vmatpush.msra.mxu0 %v147_v48  ;;  %303 = vmatpush.msra.mxu2 %v147_v48 }
  0x93   :  { %304 = vmatpush.msra.mxu3 %v147_v48 }
  0x95   :  { %v109_v52 = vpop.permute.xlu0 %108  ;;  %v40_v56 = vpop.permute.xlu1 %39 }
  0x96   :  { %v138_v54 = vadd.f32 %v109_v52, %v82_v51  ;;  %v80_v58 = vmul.f32 %v316_v22, %v40_v56 }
  0x98   :  { %v146_v55 = vmax.f32 %v138_v54, 0.0 }
  0x9a   :  { %206 = vmatpush.msra.mxu0 %v146_v55  ;;  %305 = vmatpush.msra.mxu2 %v146_v55 }
  0x9b   :  { %306 = vmatpush.msra.mxu3 %v146_v55 }
  0x9c   :  { %207 = vmatpush.msra.mxu0 %v145_v57  ;;  %307 = vmatpush.msra.mxu2 %v145_v57 }
  0x9d   :  { %308 = vmatpush.msra.mxu3 %v145_v57  ;;  %v99_v59 = vpop.permute.xlu0 %98  ;;  %v178_v3 = vpop.permute.xlu1 %177 }
  0x9e   :  { %v136_v60 = vadd.f32 %v99_v59, %v80_v58 }
  0xa0   :  { %v144_v61 = vmax.f32 %v136_v60, 0.0 }
  0xa2   :  { %208 = vmatpush.msra.mxu0 %v144_v61  ;;  %309 = vmatpush.msra.mxu2 %v144_v61 }
  0xa3   :  { %310 = vmatpush.msra.mxu3 %v144_v61  ;;  %289 = vmatmul.msk.f32.vlgmr.msra.gmra.mxu0 %vm180_vm0, %v152_v62 }
  0xa4   :  { %290 = vmatmul.msk.f32.vlgmr.msra.gmra.mxu2 %vm180_vm0, %v153_v63  ;;  %291 = vmatmul.msk.f32.vlgmr.msra.gmra.mxu3 %vm180_vm0, %v154_v0 }
  0xa5   :  { %v168_v9 = vpop.permute.xlu0 %167  ;;  %v163_v13 = vpop.permute.xlu1 %162 }
  0xac   :  { %292 = vmatmul.msk.f32.gmra.mxu3 %vm180_vm0, %v155_v1 }
 0x120   :  { %v210_v10 = vpop.f32.mrf.mxu0 }
 0x121   :  { %v211_v14 = vadd.f32 %v210_v10, %v163_v13 }
 0x123   :  { %v222_v17 = vmax.f32 %v211_v14, 0.0 }
 0x127   :  { %v216_v2 = vpop.f32.mrf.mxu3  ;;  %v213_v5 = vpop.f32.mrf.mxu2 }
 0x128   :  { %v217_v7 = vadd.f32 %v216_v2, %v173_v4  ;;  %v214_v11 = vadd.f32 %v213_v5, %v168_v9 }
 0x12a   :  { %v224_v15 = vmax.f32 %v217_v7, 0.0  ;;  %v223_v16 = vmax.f32 %v214_v11, 0.0 }
 0x12f   :  { %v219_v6 = vpop.f32.mrf.mxu3 }
 0x130   :  { %v220_v8 = vadd.f32 %v219_v6, %v178_v3 }
 0x132   :  { %v225_v12 = vmax.f32 %v220_v8, 0.0 }
 0x134   :  { %245 = vmatpush.msra.mxu1 %v225_v12 }
 0x136   :  { %246 = vmatpush.msra.mxu1 %v224_v15 }
 0x138   :  { %247 = vmatpush.msra.mxu1 %v223_v16 }
 0x13a   :  { %248 = vmatpush.msra.mxu1 %v222_v17 }
 0x13b   :  { %293 = vmatmul.msk.f32.vlgmr.msra.gmra.mxu1 %vm229_vm1, %v226_v18 }
 0x1b8   :  { %v250_v20 = vpop.f32.mrf.mxu1 }
 0x1b9   :  { %v251_v21 = vadd.f32 %v250_v20, %v228_v19 }
 0x1bb   :  { %v294_v22 = vmul.f32 -1.442695, %v251_v21 }
 0x1bd   :  { %317 = vpow2.f32 %v294_v22 }
 0x1c3   :  { %v318_v23 = vpop.eup %317 }
 0x1c4   :  { %v256_v24 = vadd.f32 1.0, %v318_v23 }
 0x1c6   :  { %319 = vrcp.f32 %v256_v24  ;;  %v268_v28 = vand.u32 2147483648, %v256_v24  ;;  %v266_v30 = vand.u32 2147483647, %v256_v24  ;;  %vm262_vm3 = vweird.f32 %v256_v24 }
 0x1c8   :  { %v269_v32 = vor.u32 1.1754944e-38, %v268_v28  ;;  %vm267_vm5 = vcmp.eq.f32.partialorder %v266_v30, 8.507059e+37 }
 0x1cc   :  { %v320_v25 = vpop.eup %319 }
 0x1cd   :  { %v258_v26 = vmul.f32 %v320_v25, %v256_v24  ;;  %vm263_vm2 = vweird.f32 %v320_v25 }
 0x1ce   :  { %vm264_vm4 = vmor %vm262_vm3, %vm263_vm2 }
 0x1cf   :  { %v259_v27 = vsub.f32 1.0, %v258_v26 }
 0x1d1   :  { %v260_v29 = vmul.f32 %v320_v25, %v259_v27 }
 0x1d3   :  { %v261_v31 = vadd.f32 %v320_v25, %v260_v29 }
 0x1d5   :  { %v265_v33 = vsel %vm264_vm4, %v320_v25, %v261_v31 }
 0x1d6   :  { %v270_v34 = vsel %vm267_vm5, %v269_v32, %v265_v33 }
 0x1d7   :  { %272 = vst [vmem:[#allocation3] sm:$0x1] %v270_v34 }
 0x1d8   :  { %283 = dma.vmem_to_hbm [thread:$0]  %s279_s27, 16, %s281_s6, [#allocation4]  }
 0x1d9   :  { %345 = dma.done.wait [#allocation4], 16  }
 0x1da   :  { %346 = vsyncadd [#allocation4], 4294967280 }
 0x1db   :  { %288 = vsyncpa [#allocation4], 1 }

</bundles_post_ra>
